<compile_context>
chip_gen: v6e
topology: v6e:2x2x1
jax: 0.10.0
libtpu: 0.0.40
codegen_flags: <defaults>
</compile_context>

<pallas_src>
import jax
import jax.numpy as jnp
from jax.experimental import pallas as pl
from jax.experimental.pallas import tpu as pltpu


def _aux_occ_kernel(p_ref, w3_ref, b3_ref, w1_ref, b1_ref, out_ref):
    """One M-tile: stem (3x3-as-im2col matmul + bias + SiLU) then pred (1x1).

    p_ref : (K, TM)  bf16   im2col patches (K = 9*Cin), spatial on lanes
    w3_ref: (C0, K)  bf16   stem conv weight, flattened tap-major/cin-minor
    b3_ref: (C0, 1)  f32    stem bias (column, broadcasts over lanes)
    w1_ref: (VY, C0) bf16   pred 1x1 conv weight
    b1_ref: (VY, 1)  f32    pred bias
    out_ref:(VY, TM) f32    lane-dense output tile
    """
    # (C0, K) @ (K, TM) -> (C0, TM), f32 accumulation on the MXU.
    acc = jnp.dot(w3_ref[...], p_ref[...], preferred_element_type=jnp.float32)
    acc = acc + b3_ref[...]                       # (C0, TM) + (C0, 1)
    y = acc * jax.nn.sigmoid(acc)                 # SiLU in f32 (EUP sigmoid)
    # (VY, C0) @ (C0, TM) -> (VY, TM); lane-dense store.
    z = jnp.dot(w1_ref[...], y.astype(jnp.bfloat16),
                preferred_element_type=jnp.float32)
    out_ref[...] = z + b1_ref[...]


def _im2col_t(x_nchw):
    """(B, Cin, H, W) -> (9*Cin, B*H*W) patch matrix (tap-major, cin-minor).

    Done in plain JAX (one fused HBM pass); this removes the 9 shifted
    slice+reshape relayouts from the kernel body.
    """
    B, Cin, H, W = x_nchw.shape
    xp = jnp.pad(x_nchw, ((0, 0), (0, 0), (1, 1), (1, 1)))
    taps = [xp[:, :, dy:dy + H, dx:dx + W]
            for dy in range(3) for dx in range(3)]        # 9 x (B, Cin, H, W)
    p = jnp.stack(taps, axis=0)                           # (9, B, Cin, H, W)
    p = jnp.transpose(p, (0, 2, 1, 3, 4))                 # (9, Cin, B, H, W)
    return p.reshape(9 * Cin, B * H * W)


@jax.jit
def aux_occ_level(x_nchw, w3_2d, b3_col, w1_2d, b1_col):
    """Apply stem + pred of one level.  x_nchw: (B, Cin, H, W) float32."""
    B, Cin, H, W = x_nchw.shape
    C0, K = w3_2d.shape
    VY = w1_2d.shape[0]
    M = B * H * W

    patches = _im2col_t(x_nchw).astype(jnp.bfloat16)      # (K, M)

    # Tile the (parallel) M axis: 256 keeps VMEM bounded at real BEV sizes
    # and gives both v7x TensorCores work when M >= 512.
    if M % 256 == 0:
        TM = 256
    elif M % 128 == 0:
        TM = 128
    else:
        TM = M                                            # full-dim fallback
    grid = (M // TM,)

    z = pl.pallas_call(
        _aux_occ_kernel,
        out_shape=jax.ShapeDtypeStruct((VY, M), jnp.float32),
        grid_spec=pltpu.PrefetchScalarGridSpec(
            num_scalar_prefetch=0,
            grid=grid,
            in_specs=[
                pl.BlockSpec((K, TM), lambda m: (0, m)),
                pl.BlockSpec((C0, K), lambda m: (0, 0)),
                pl.BlockSpec((C0, 1), lambda m: (0, 0)),
                pl.BlockSpec((VY, C0), lambda m: (0, 0)),
                pl.BlockSpec((VY, 1), lambda m: (0, 0)),
            ],
            out_specs=pl.BlockSpec((VY, TM), lambda m: (0, m)),
        ),
        compiler_params=pltpu.CompilerParams(
            dimension_semantics=("parallel",)),
    )(patches, w3_2d, b3_col, w1_2d, b1_col)

    # (VY, B*H*W) -> NCHW (B, VY, H, W); tiny output, one cheap pass.
    return jnp.transpose(z.reshape(VY, B, H, W), (1, 0, 2, 3))


class AUXOCCHeadPallas:
    """Pallas re-implementation of AUXOCCHead.forward (training branch)."""

    def __init__(self, in_features=("bev_fpn3", "bev_fpn4", "bev_fpn5"),
                 in_channels=(32, 64, 128), vox_y=4, key=None):
        self.in_features = in_features
        self.in_channels = list(in_channels)
        self.vox_y = vox_y
        c0 = self.in_channels[0]
        if key is None:
            key = jax.random.PRNGKey(0)
        self.torch_params = []    # PyTorch layouts (OIHW), for the reference
        self.kernel_params = []   # kernel layouts (bf16 matmul operands)
        for cin in self.in_channels:
            key, k1, k2, k3, k4 = jax.random.split(key, 5)
            # stem: Conv2d(cin, c0, 3, padding=1, bias=True) + SiLU   (OIHW)
            w3 = jax.random.normal(k1, (c0, cin, 3, 3), jnp.float32) * 0.05
            b3 = jax.random.normal(k2, (c0,), jnp.float32) * 0.05
            # pred: Conv2d(c0, vox_y, 1, bias=True)
            w1 = jax.random.normal(k3, (vox_y, c0, 1, 1), jnp.float32) * 0.05
            b1 = jax.random.normal(k4, (vox_y,), jnp.float32) * 0.05
            self.torch_params.append((w3, b3, w1, b1))
            # (C0, Cin, 3, 3) -> (C0, 3, 3, Cin) -> (C0, 9*Cin):
            # tap-major / cin-minor, matching _im2col_t's patch ordering.
            w3_2d = jnp.transpose(w3, (0, 2, 3, 1)).reshape(c0, 9 * cin)
            self.kernel_params.append((
                w3_2d.astype(jnp.bfloat16),
                b3.reshape(c0, 1).astype(jnp.float32),
                w1.reshape(vox_y, c0).astype(jnp.bfloat16),
                b1.reshape(vox_y, 1).astype(jnp.float32),
            ))

    def __call__(self, inputs):
        """inputs: dict name -> NCHW array (matching the PyTorch interface)."""
        ys = []
        for f, kp in zip(self.in_features, self.kernel_params):
            x_nchw = inputs[f].astype(jnp.float32)
            ys.append(aux_occ_level(x_nchw, *kp))           # NCHW (B, VY, H, W)
        return ys


def _reference_level(x_nchw, w3, b3, w1, b1):
    """Pure-JAX reference (lax conv) with the same bf16-operand / f32-accum
    numerics as the kernel."""
    y = jax.lax.conv_general_dilated(
        x_nchw.astype(jnp.bfloat16), w3.astype(jnp.bfloat16),
        window_strides=(1, 1), padding="SAME",
        dimension_numbers=("NCHW", "OIHW", "NCHW"),
        preferred_element_type=jnp.float32)
    y = y + b3.reshape(1, -1, 1, 1)
    y = y * jax.nn.sigmoid(y)
    z = jnp.einsum("bchw,vc->bvhw", y.astype(jnp.bfloat16),
                   w1.reshape(w1.shape[0], w1.shape[1]).astype(jnp.bfloat16),
                   preferred_element_type=jnp.float32)
    return z + b1.reshape(1, -1, 1, 1)


if __name__ == "__main__":
    key = jax.random.PRNGKey(0)
    # Small shapes consistent with the module's pyramid structure.
    B = 2
    in_channels = [32, 64, 128]
    spatials = [16, 8, 8]          # per-level H = W
    vox_y = 4

    head = AUXOCCHeadPallas(in_channels=in_channels, vox_y=vox_y,
                            key=jax.random.PRNGKey(42))

    inputs = {}
    for f, c, s in zip(head.in_features, in_channels, spatials):
        key, sub = jax.random.split(key)
        inputs[f] = jax.random.normal(sub, (B, c, s, s), jnp.float32)  # NCHW

    ys = head(inputs)
    ys = [jax.block_until_ready(y) for y in ys]

    # Validate against a pure-JAX reference with matching bf16 matmul inputs.
    for (f, tp), y in zip(zip(head.in_features, head.torch_params), ys):
        ref = _reference_level(inputs[f], *tp)
        assert y.shape == ref.shape, (y.shape, ref.shape)
        err = float(jnp.max(jnp.abs(y - ref)))
        assert err < 5e-3, f"level {f} mismatch, max abs err {err}"

    print("KERNEL_OK")
</pallas_src>

<mosaic_0001>
module attributes {stable_mosaic.version = 11 : i64} {
  func.func @_aux_occ_kernel(%arg0: i32, %arg1: memref<288x256xbf16, #tpu.memory_space<vmem>>, %arg2: memref<32x288xbf16, #tpu.memory_space<vmem>>, %arg3: memref<32x1xf32, #tpu.memory_space<vmem>>, %arg4: memref<4x32xbf16, #tpu.memory_space<vmem>>, %arg5: memref<4x1xf32, #tpu.memory_space<vmem>>, %arg6: memref<4x256xf32, #tpu.memory_space<vmem>>) attributes {dimension_semantics = [#tpu.dimension_semantics<parallel>], iteration_bounds = array<i64: 2>, scalar_prefetch = 0 : i64, scratch_operands = 0 : i64, tpu.core_type = #tpu.core_type<tc>, window_params = [{transform_indices = @transform_0, window_bounds = array<i64: 288, 256>}, {pipeline_mode = #tpu.pipeline_mode<synchronous>, transform_indices = @transform_1, window_bounds = array<i64: 32, 288>}, {pipeline_mode = #tpu.pipeline_mode<synchronous>, transform_indices = @transform_2, window_bounds = array<i64: 32, 1>}, {pipeline_mode = #tpu.pipeline_mode<synchronous>, transform_indices = @transform_3, window_bounds = array<i64: 4, 32>}, {pipeline_mode = #tpu.pipeline_mode<synchronous>, transform_indices = @transform_4, window_bounds = array<i64: 4, 1>}, {transform_indices = @transform_5, window_bounds = array<i64: 4, 256>}]} {
    %c0 = arith.constant 0 : index
    %c0_0 = arith.constant 0 : index
    %0 = vector.load %arg2[%c0, %c0_0] : memref<32x288xbf16, #tpu.memory_space<vmem>>, vector<32x288xbf16>
    %c0_1 = arith.constant 0 : index
    %c0_2 = arith.constant 0 : index
    %1 = vector.load %arg1[%c0_1, %c0_2] : memref<288x256xbf16, #tpu.memory_space<vmem>>, vector<288x256xbf16>
    %cst = arith.constant dense<0.000000e+00> : vector<32x256xf32>
    %2 = tpu.matmul %0, %1, %cst {dimension_numbers = #tpu.dot_dimension_numbers<[1], [0], [0], [1], [0, 0, 1, 1], [], []>} : vector<32x288xbf16>, vector<288x256xbf16>, vector<32x256xf32> -> vector<32x256xf32>
    %c0_3 = arith.constant 0 : index
    %c0_4 = arith.constant 0 : index
    %3 = vector.load %arg3[%c0_3, %c0_4] : memref<32x1xf32, #tpu.memory_space<vmem>>, vector<32x1xf32>
    %4 = vector.broadcast %3 : vector<32x1xf32> to vector<32x256xf32>
    %5 = arith.addf %2, %4 : vector<32x256xf32>
    %6 = arith.negf %5 : vector<32x256xf32>
    %7 = math.exp %6 : vector<32x256xf32>
    %cst_5 = arith.constant 1.000000e+00 : f32
    %8 = vector.broadcast %cst_5 : f32 to vector<32x256xf32>
    %9 = arith.addf %8, %7 : vector<32x256xf32>
    %10 = arith.divf %8, %9 : vector<32x256xf32>
    %11 = arith.mulf %5, %10 : vector<32x256xf32>
    %c0_6 = arith.constant 0 : index
    %c0_7 = arith.constant 0 : index
    %12 = vector.load %arg4[%c0_6, %c0_7] : memref<4x32xbf16, #tpu.memory_space<vmem>>, vector<4x32xbf16>
    %13 = arith.truncf %11 : vector<32x256xf32> to vector<32x256xbf16>
    %cst_8 = arith.constant dense<0.000000e+00> : vector<4x256xf32>
    %14 = tpu.matmul %12, %13, %cst_8 {dimension_numbers = #tpu.dot_dimension_numbers<[1], [0], [0], [1], [0, 0, 1, 1], [], []>} : vector<4x32xbf16>, vector<32x256xbf16>, vector<4x256xf32> -> vector<4x256xf32>
    %c0_9 = arith.constant 0 : index
    %c0_10 = arith.constant 0 : index
    %15 = vector.load %arg5[%c0_9, %c0_10] : memref<4x1xf32, #tpu.memory_space<vmem>>, vector<4x1xf32>
    %16 = vector.broadcast %15 : vector<4x1xf32> to vector<4x256xf32>
    %17 = arith.addf %14, %16 : vector<4x256xf32>
    %c0_11 = arith.constant 0 : index
    %c0_12 = arith.constant 0 : index
    %18 = vector.load %arg6[%c0_11, %c0_12] : memref<4x256xf32, #tpu.memory_space<vmem>>, vector<4x256xf32>
    tpu.vector_store %arg6[%c0_11, %c0_12], %17 {strides = array<i32>} : memref<4x256xf32, #tpu.memory_space<vmem>>, vector<4x256xf32>,
    return
  }
  func.func @transform_0(%arg0: i32) -> (i32, i32) {
    %c0_i32 = arith.constant 0 : i32
    %c0_i32_0 = arith.constant 0 : i32
    return %c0_i32, %arg0 : i32, i32
  }
  func.func @transform_1(%arg0: i32) -> (i32, i32) {
    %c0_i32 = arith.constant 0 : i32
    %c0_i32_0 = arith.constant 0 : i32
    %c0_i32_1 = arith.constant 0 : i32
    return %c0_i32, %c0_i32_0 : i32, i32
  }
  func.func @transform_2(%arg0: i32) -> (i32, i32) {
    %c0_i32 = arith.constant 0 : i32
    %c0_i32_0 = arith.constant 0 : i32
    %c0_i32_1 = arith.constant 0 : i32
    return %c0_i32, %c0_i32_0 : i32, i32
  }
  func.func @transform_3(%arg0: i32) -> (i32, i32) {
    %c0_i32 = arith.constant 0 : i32
    %c0_i32_0 = arith.constant 0 : i32
    %c0_i32_1 = arith.constant 0 : i32
    return %c0_i32, %c0_i32_0 : i32, i32
  }
  func.func @transform_4(%arg0: i32) -> (i32, i32) {
    %c0_i32 = arith.constant 0 : i32
    %c0_i32_0 = arith.constant 0 : i32
    %c0_i32_1 = arith.constant 0 : i32
    return %c0_i32, %c0_i32_0 : i32, i32
  }
  func.func @transform_5(%arg0: i32) -> (i32, i32) {
    %c0_i32 = arith.constant 0 : i32
    %c0_i32_0 = arith.constant 0 : i32
    return %c0_i32, %arg0 : i32, i32
  }
}

</mosaic_0001>

<bundles_post_ra>
// kernel: aux_occ_level.1
= control target key start
LH: loop header
LB: loop body
LE: loop exit
PB: predicated region body
PF: predicated region fallthrough
CT: control target
= control target key end

     0   :  { %s1216_s18 = smov 0   ;;  %s1218_s19 = smov 0   ;;  %s1442_s0 = inlined_call_operand.vmem [shape: bf16[288,512], index: 0, kind: input, shape index: {}]   ;;  %s1443_s1 = inlined_call_operand.vmem [shape: bf16[32,288], index: 1, kind: input, shape index: {}]   ;;  %s1444_s2 = inlined_call_operand.vmem [shape: f32[32,1], index: 2, kind: input, shape index: {}]   ;;  %s1445_s3 = inlined_call_operand.vmem [shape: bf16[4,32], index: 3, kind: input, shape index: {}]   ;;  %s1446_s4 = inlined_call_operand.vmem [shape: f32[4,1], index: 4, kind: input, shape index: {}]   ;;  %s1447_s5 = inlined_call_operand.vmem [shape: f32[4,512], index: 5, kind: output, shape index: {}]  }
   0x1   :  { %s1220_s20 = smov 0  }
   0x2 LB: > { %s973_s21 = sadd.s32 4294967295, %s1183_s20   ;;  %s1233_s22 = sadd.s32 1, %s1183_s20   ;;  %s1183_s20 = sphi %s1220_s20, %s1450_s20   ;;  %s1179_s19 = sphi %s1218_s19, %s1449_s19   ;;  %s1175_s18 = sphi %s1216_s18, %s1448_s18  }
   0x3   : > { %s19_s23 = ssub.s32 %s1183_s20, %s1233_s22  ;;  %s22_s24 = sadd.s32 1, %s1179_s19 }
   0x4   : > { %p20_p0 = scmp.eq.s32.totalorder %s19_s23, 0  ;;  %p29_p1 = scmp.ne.s32.totalorder %s1179_s19, %s1175_s18 }
   0x5   : > { %p30_p2 = scmp.eq.s32.totalorder %s1183_s20, 0  ;;  %p976_p4 = scmp.ge.s32.totalorder %s1183_s20, 2 }
   0x6   : > { %s1242_s25 = scalar_select %p20_p0, %s1179_s19, %s22_s24  }
   0x7   : > { %p31_p3 = por %p30_p2, %p29_p1  ;;  %177 = sbr.rel (%p976_p4) target bundleno = 34 (0x22), region = 32 }
   0xc   : > { %180 = sbr.rel (!%p31_p3) target bundleno = 34 (0x22), region = 36  ;;  %s182_s26 = sand.u32 (%p31_p3), 1, %s1179_s19  }
   0xd   : > { %s1037_s27 = sshll.u32 (%p31_p3), %s1183_s20, 3  ;;  %s1038_s28 = smul.u32 (%p31_p3), 288, %s182_s26 }
   0xe   : > { %s1250_s6 = scalar_lea.vmem (%p31_p3), %s1442_s0, %s1037_s27 }
   0xf   : > { %v286_v0 = vld [vmem:[%s1250_s6] sm:$0xff] (%p31_p3)  ;;  %v288_v1 = vld [vmem:[%s1250_s6 + $0x10] sm:$0xff] (%p31_p3)  ;;  %s1258_s7 = scalar_lea.vmem (%p31_p3), [#allocation2], %s1038_s28 }
  0x10   : > { %v290_v2 = vld [vmem:[%s1250_s6 + $0x20] sm:$0xff] (%p31_p3)  ;;  %v292_v3 = vld [vmem:[%s1250_s6 + $0x30] sm:$0xff] (%p31_p3)  ;;  %287 = vst [vmem:[%s1258_s7] sm:$0xff] (%p31_p3), %v286_v0  ;;  %289 = vst [vmem:[%s1258_s7 + $0x8] sm:$0xff] (%p31_p3), %v288_v1 }
  0x11   : > { %v294_v4 = vld [vmem:[%s1250_s6 + $0x40] sm:$0xff]  ;;  %v296_v5 = vld [vmem:[%s1250_s6 + $0x50] sm:$0xff]  ;;  %291 = vst [vmem:[%s1258_s7 + $0x10] sm:$0xff] %v290_v2  ;;  %293 = vst [vmem:[%s1258_s7 + $0x18] sm:$0xff] %v292_v3 }
  0x12   : > { %295 = vst [vmem:[%s1258_s7 + $0x20] sm:$0xff] %v294_v4  ;;  %297 = vst [vmem:[%s1258_s7 + $0x28] sm:$0xff] %v296_v5  ;;  %v298_v6 = vld [vmem:[%s1250_s6 + $0x60] sm:$0xff]  ;;  %v300_v7 = vld [vmem:[%s1250_s6 + $0x70] sm:$0xff] }
  0x13   : > { %v302_v8 = vld [vmem:[%s1250_s6 + $0x80] sm:$0xff]  ;;  %299 = vst [vmem:[%s1258_s7 + $0x30] sm:$0xff] %v298_v6  ;;  %301 = vst [vmem:[%s1258_s7 + $0x38] sm:$0xff] %v300_v7  ;;  %v304_v9 = vld [vmem:[%s1250_s6 + $0x90] sm:$0xff] }
  0x14   : > { %303 = vst [vmem:[%s1258_s7 + $0x40] sm:$0xff] %v302_v8  ;;  %v306_v10 = vld [vmem:[%s1250_s6 + $0xa0] sm:$0xff]  ;;  %v308_v11 = vld [vmem:[%s1250_s6 + $0xb0] sm:$0xff]  ;;  %305 = vst [vmem:[%s1258_s7 + $0x48] sm:$0xff] %v304_v9 }
  0x15   : > { %307 = vst [vmem:[%s1258_s7 + $0x50] sm:$0xff] %v306_v10  ;;  %309 = vst [vmem:[%s1258_s7 + $0x58] sm:$0xff] %v308_v11  ;;  %v310_v12 = vld [vmem:[%s1250_s6 + $0xc0] sm:$0xff]  ;;  %v312_v13 = vld [vmem:[%s1250_s6 + $0xd0] sm:$0xff] }
  0x16   : > { %v314_v14 = vld [vmem:[%s1250_s6 + $0xe0] sm:$0xff]  ;;  %311 = vst [vmem:[%s1258_s7 + $0x60] sm:$0xff] %v310_v12  ;;  %313 = vst [vmem:[%s1258_s7 + $0x68] sm:$0xff] %v312_v13  ;;  %v316_v15 = vld [vmem:[%s1250_s6 + $0xf0] sm:$0xff] }
  0x17   : > { %315 = vst [vmem:[%s1258_s7 + $0x70] sm:$0xff] %v314_v14  ;;  %v318_v16 = vld [vmem:[%s1250_s6 + $0x100] sm:$0xff]  ;;  %v320_v17 = vld [vmem:[%s1250_s6 + $0x110] sm:$0xff]  ;;  %317 = vst [vmem:[%s1258_s7 + $0x78] sm:$0xff] %v316_v15 }
  0x18   : > { %319 = vst [vmem:[%s1258_s7 + $0x80] sm:$0xff] %v318_v16  ;;  %321 = vst [vmem:[%s1258_s7 + $0x88] sm:$0xff] %v320_v17  ;;  %v322_v18 = vld [vmem:[%s1250_s6 + $0x120] sm:$0xff]  ;;  %v324_v19 = vld [vmem:[%s1250_s6 + $0x130] sm:$0xff] }
  0x19   : > { %v326_v20 = vld [vmem:[%s1250_s6 + $0x140] sm:$0xff]  ;;  %323 = vst [vmem:[%s1258_s7 + $0x90] sm:$0xff] %v322_v18  ;;  %325 = vst [vmem:[%s1258_s7 + $0x98] sm:$0xff] %v324_v19  ;;  %v328_v21 = vld [vmem:[%s1250_s6 + $0x150] sm:$0xff] }
  0x1a   : > { %327 = vst [vmem:[%s1258_s7 + $0xa0] sm:$0xff] %v326_v20  ;;  %v330_v22 = vld [vmem:[%s1250_s6 + $0x160] sm:$0xff]  ;;  %v332_v23 = vld [vmem:[%s1250_s6 + $0x170] sm:$0xff]  ;;  %329 = vst [vmem:[%s1258_s7 + $0xa8] sm:$0xff] %v328_v21 }
  0x1b   : > { %331 = vst [vmem:[%s1258_s7 + $0xb0] sm:$0xff] %v330_v22  ;;  %333 = vst [vmem:[%s1258_s7 + $0xb8] sm:$0xff] %v332_v23  ;;  %v334_v24 = vld [vmem:[%s1250_s6 + $0x180] sm:$0xff]  ;;  %v336_v25 = vld [vmem:[%s1250_s6 + $0x190] sm:$0xff] }
  0x1c   : > { %v338_v26 = vld [vmem:[%s1250_s6 + $0x1a0] sm:$0xff]  ;;  %335 = vst [vmem:[%s1258_s7 + $0xc0] sm:$0xff] %v334_v24  ;;  %337 = vst [vmem:[%s1258_s7 + $0xc8] sm:$0xff] %v336_v25  ;;  %v340_v27 = vld [vmem:[%s1250_s6 + $0x1b0] sm:$0xff] }
  0x1d   : > { %339 = vst [vmem:[%s1258_s7 + $0xd0] sm:$0xff] %v338_v26  ;;  %v342_v28 = vld [vmem:[%s1250_s6 + $0x1c0] sm:$0xff]  ;;  %v344_v29 = vld [vmem:[%s1250_s6 + $0x1d0] sm:$0xff]  ;;  %341 = vst [vmem:[%s1258_s7 + $0xd8] sm:$0xff] %v340_v27 }
  0x1e   : > { %343 = vst [vmem:[%s1258_s7 + $0xe0] sm:$0xff] %v342_v28  ;;  %345 = vst [vmem:[%s1258_s7 + $0xe8] sm:$0xff] %v344_v29  ;;  %v346_v30 = vld [vmem:[%s1250_s6 + $0x1e0] sm:$0xff]  ;;  %v348_v31 = vld [vmem:[%s1250_s6 + $0x1f0] sm:$0xff] }
  0x1f   : > { %v350_v32 = vld [vmem:[%s1250_s6 + $0x200] sm:$0xff]  ;;  %347 = vst [vmem:[%s1258_s7 + $0xf0] sm:$0xff] %v346_v30  ;;  %349 = vst [vmem:[%s1258_s7 + $0xf8] sm:$0xff] %v348_v31  ;;  %v352_v33 = vld [vmem:[%s1250_s6 + $0x210] sm:$0xff] }
  0x20   : > { %351 = vst [vmem:[%s1258_s7 + $0x100] sm:$0xff] %v350_v32  ;;  %v354_v34 = vld [vmem:[%s1250_s6 + $0x220] sm:$0xff]  ;;  %v356_v35 = vld [vmem:[%s1250_s6 + $0x230] sm:$0xff]  ;;  %353 = vst [vmem:[%s1258_s7 + $0x108] sm:$0xff] %v352_v33 }
  0x21   : > { %355 = vst [vmem:[%s1258_s7 + $0x110] sm:$0xff] %v354_v34  ;;  %357 = vst [vmem:[%s1258_s7 + $0x118] sm:$0xff] %v356_v35 }
  0x22 PF: > { %p979_p5 = scmp.ge.s32.totalorder %s1183_s20, 1  ;;  %p362_p6 = scmp.lt.s32.totalorder %s1183_s20, 3 }
  0x24   : > { %p363_p7 = pnand %p979_p5, %p362_p6 }
  0x25   : > { %s369_s8 = sand.u32 (!%p363_p7), 1, %s1175_s18   ;;  %s980_s15 = sshll.u32 (!%p363_p7), %s973_s21, 1 }
  0x26   : > { %366 = sbr.rel (%p363_p7) target bundleno = 565 (0x235), region = 74  ;;  %p398_p8 = scmp.lt.s32.totalorder (!%p363_p7), %s980_s15, 3 }
  0x27   : > { %s1039_s9 = smul.u32 (!%p363_p7), 288, %s369_s8 }
  0x29   : > { %s1335_s12 = scalar_lea.vmem (!%p363_p7), [#allocation2], %s1039_s9 }
  0x2b   : > { %v1185_v36 = vmov 0   ;;  %v1124_v37 = vld [vmem:[%s1443_s1 + $0x4] ss:$12 sps:$4 sm:$0xff]   ;;  %v1067_v38 = vld [vmem:[%s1335_s12 + $0x74] ss:$8 sps:$4 sm:$0xff]   ;;  %vm682_vm0 = vcmask 261120  }
  0x2c   : > { %774 = vmatprep.mubr.bf16.mxu1 %v1185_v36  ;;  %1066 = vset.pattern.permute.xlu1 %v1185_v36  ;;  %v1069_v39 = vld [vmem:[%s1335_s12 + $0x70] ss:$8 sps:$4 sm:$0xff]   ;;  %v1070_v40 = vld [vmem:[%s1335_s12 + $0x64] ss:$8 sps:$4 sm:$0xff]   ;;  %v1072_v41 = vld [vmem:[%s1335_s12 + $0x60] ss:$8 sps:$4 sm:$0xff]  }
  0x2d   : > { %1065 = vset.pattern.permute.xlu0 %v1185_v36  ;;  %721 = vmatprep.mubr.bf16.mxu0 %v1124_v37  ;;  %v1073_v42 = vld [vmem:[%s1335_s12 + $0x54] ss:$8 sps:$4 sm:$0xff]   ;;  %v1075_v43 = vld [vmem:[%s1335_s12 + $0x50] ss:$8 sps:$4 sm:$0xff]   ;;  %v1076_v44 = vld [vmem:[%s1335_s12 + $0x44] ss:$8 sps:$4 sm:$0xff]  }
  0x2e   : > { %689 = vmatprep.subr.bf16.mxu0 %v1067_v38  ;;  %v1078_v45 = vld [vmem:[%s1335_s12 + $0x40] ss:$8 sps:$4 sm:$0xff]   ;;  %v1079_v46 = vld [vmem:[%s1335_s12 + $0x34] ss:$8 sps:$4 sm:$0xff]   ;;  %v1081_v47 = vld [vmem:[%s1335_s12 + $0x30] ss:$8 sps:$4 sm:$0xff]  }
  0x2f   : > { %690 = vmatpush1.bf16.msra.mxu0 %v1069_v39  ;;  %v1082_v48 = vld [vmem:[%s1335_s12 + $0x24] ss:$8 sps:$4 sm:$0xff]   ;;  %v1084_v49 = vld [vmem:[%s1335_s12 + $0x20] ss:$8 sps:$4 sm:$0xff]   ;;  %v1108_v50 = vld [vmem:[%s1335_s12 + $0x114] ss:$8 sps:$4 sm:$0xff]  }
  0x30   : > { %691 = vmatprep.subr.bf16.mxu0 %v1070_v40  ;;  %v1111_v51 = vld [vmem:[%s1335_s12 + $0x110] ss:$8 sps:$4 sm:$0xff]   ;;  %v1085_v52 = vld [vmem:[%s1335_s12 + $0x14] ss:$8 sps:$4 sm:$0xff]   ;;  %754 = vmatprep.subr.bf16.mxu1 %v1108_v50  ;;  %v1114_v53 = vld [vmem:[%s1335_s12 + $0x104] ss:$8 sps:$4 sm:$0xff]  }
  0x31   : > { %755 = vmatpush1.bf16.msra.mxu1 %v1111_v51  ;;  %v1117_v54 = vld [vmem:[%s1335_s12 + $0x100] ss:$8 sps:$4 sm:$0xff]   ;;  %v1087_v55 = vld [vmem:[%s1335_s12 + $0x10] ss:$8 sps:$4 sm:$0xff]   ;;  %v1088_v56 = vld [vmem:[%s1335_s12 + $0x4] ss:$8 sps:$4 sm:$0xff]  }
  0x32   : > { %756 = vmatprep.subr.bf16.mxu1 %v1114_v53  ;;  %v1120_v57 = vld [vmem:[%s1443_s1 + $0x8] ss:$12 sps:$4 sm:$0xff]   ;;  %v448_v58 = vld [vmem:[%s1444_s2] sm:$0xff]  ;;  %v451_v63 = vld [vmem:[%s1444_s2 + $0x18] sm:$0xff]  ;;  %s1452_s15 = smov (!%p398_p8, %s980_s15), 3 }
  0x33   : > { %692 = vmatpush1.bf16.msra.mxu0 %v1072_v41  ;;  %v450_v59 = vld [vmem:[%s1444_s2 + $0x10] sm:$0xff]  ;;  %454 = vperm.xlu1 %1066, %v448_v58   ;;  %v1090_v60 = vld [vmem:[%s1335_s12] ss:$8 sps:$4 sm:$0xff]   ;;  %v1094_v1 = vld [vmem:[%s1335_s12 + $0xe4] ss:$8 sps:$4 sm:$0xff]   ;;  %s981_s16 = sshll.u32 %s1452_s15, 2 }
  0x34   : > { %693 = vmatprep.subr.bf16.mxu0 %v1073_v42  ;;  %464 = vperm.xlu0 %1065, %v450_v59   ;;  %v449_v61 = vld [vmem:[%s1444_s2 + $0x8] sm:$0xff]  ;;  %v1091_v62 = vld [vmem:[%s1335_s12 + $0xf4] ss:$8 sps:$4 sm:$0xff]   ;;  %v1093_v0 = vld [vmem:[%s1335_s12 + $0xf0] ss:$8 sps:$4 sm:$0xff]   ;;  %s401_s23 = scalar_lea.vmem %s1447_s5, %s981_s16 }
  0x35   : > { %757 = vmatpush1.bf16.msra.mxu1 %v1117_v54  ;;  %v856_v2 = vld [vmem:[%s1446_s4] sm:$0xf]  ;;  %v1097_v5 = vld [vmem:[%s1335_s12 + $0xd4] ss:$8 sps:$4 sm:$0xff]   ;;  %v1099_v6 = vld [vmem:[%s1335_s12 + $0xd0] ss:$8 sps:$4 sm:$0xff]  }
  0x36   : > { %v1125_v3 = vld [vmem:[%s1443_s1 + $0x20] ss:$12 sps:$4 sm:$0xff]   ;;  %v1103_v9 = vld [vmem:[%s1335_s12 + $0xb4] ss:$8 sps:$4 sm:$0xff]   ;;  %v1105_v10 = vld [vmem:[%s1335_s12 + $0xb0] ss:$8 sps:$4 sm:$0xff]  }
  0x37   : > { %694 = vmatpush1.bf16.msra.mxu0 %v1075_v43  ;;  %459 = vperm.xlu1 %1066, %v449_v61   ;;  %v1096_v4 = vld [vmem:[%s1335_s12 + $0xe0] ss:$8 sps:$4 sm:$0xff]   ;;  %v1100_v7 = vld [vmem:[%s1335_s12 + $0xc4] ss:$8 sps:$4 sm:$0xff]   ;;  %v1112_v13 = vld [vmem:[%s1335_s12 + $0x94] ss:$8 sps:$4 sm:$0xff]  }
  0x38   : > { %695 = vmatprep.subr.bf16.mxu0 %v1076_v44  ;;  %1024 = vmatmul.mubr.msk.bf16.vlgmr.msra.gmra.mxu1 %vm682_vm0, %v1120_v57  ;;  %v1102_v8 = vld [vmem:[%s1335_s12 + $0xc0] ss:$8 sps:$4 sm:$0xff]   ;;  %v1106_v11 = vld [vmem:[%s1335_s12 + $0xa4] ss:$8 sps:$4 sm:$0xff]   ;;  %v1116_v14 = vld [vmem:[%s1335_s12 + $0x90] ss:$8 sps:$4 sm:$0xff]  }
  0x39   : > { %784 = vmatprep.mubr.bf16.mxu1 %v1185_v36  ;;  %469 = vperm.xlu0 %1065, %v451_v63   ;;  %v1110_v12 = vld [vmem:[%s1335_s12 + $0xa0] ss:$8 sps:$4 sm:$0xff]   ;;  %v1118_v15 = vld [vmem:[%s1335_s12 + $0x84] ss:$8 sps:$4 sm:$0xff]  }
  0x3a   : > { %v1121_v16 = vld [vmem:[%s1335_s12 + $0x80] ss:$8 sps:$4 sm:$0xff]   ;;  %v1128_v19 = vld [vmem:[%s1443_s1 + $0x18] ss:$12 sps:$4 sm:$0xff]  }
  0x3b   : > { %696 = vmatpush1.bf16.msra.mxu0 %v1078_v45  ;;  %v1122_v17 = vld [vmem:[%s1443_s1] ss:$12 sps:$4 sm:$0xff]   ;;  %v1126_v18 = vld [vmem:[%s1443_s1 + $0x1c] ss:$12 sps:$4 sm:$0xff]  }
  0x3c   : > { %697 = vmatprep.subr.bf16.mxu0 %v1079_v46 }
  0x3d   : > { %859 = vperm.xlu0 %1065, %v856_v2  }
  0x3f   : > { %698 = vmatpush1.bf16.msra.mxu0 %v1081_v47 }
  0x40   : > { %699 = vmatprep.subr.bf16.mxu0 %v1082_v48  ;;  %1025 = vmatmul.mubr.msk.bf16.gmra.mxu1 %vm682_vm0, %v1125_v3 }
  0x41   : > { %897 = vmatprep.mubr.bf16.mxu1 %v1185_v36 }
  0x43   : > { %700 = vmatpush1.bf16.msra.mxu0 %v1084_v49 }
  0x44   : > { %701 = vmatprep.subr.bf16.mxu0 %v1085_v52 }
  0x47   : > { %702 = vmatpush1.bf16.msra.mxu0 %v1087_v55 }
  0x48   : > { %703 = vmatprep.subr.bf16.mxu0 %v1088_v56 }
  0x4b   : > { %704 = vmatpush1.bf16.msra.mxu0 %v1090_v60 }
  0x4c   : > { %705 = vmatprep.subr.bf16.mxu0 %v1091_v62 }
  0x4f   : > { %706 = vmatpush2.bf16.msra.mxu0 %v1093_v0 }
  0x50   : > { %707 = vmatprep.subr.bf16.mxu0 %v1094_v1 }
  0x53   : > { %708 = vmatpush2.bf16.msra.mxu0 %v1096_v4 }
  0x54   : > { %709 = vmatprep.subr.bf16.mxu0 %v1097_v5 }
  0x57   : > { %710 = vmatpush2.bf16.msra.mxu0 %v1099_v6 }
  0x58   : > { %711 = vmatprep.subr.bf16.mxu0 %v1100_v7 }
  0x5b   : > { %712 = vmatpush2.bf16.msra.mxu0 %v1102_v8 }
  0x5c   : > { %713 = vmatprep.subr.bf16.mxu0 %v1103_v9 }
  0x5f   : > { %714 = vmatpush2.bf16.msra.mxu0 %v1105_v10 }
  0x60   : > { %715 = vmatprep.subr.bf16.mxu0 %v1106_v11 }
  0x63   : > { %716 = vmatpush2.bf16.msra.mxu0 %v1110_v12 }
  0x64   : > { %717 = vmatprep.subr.bf16.mxu0 %v1112_v13 }
  0x67   : > { %718 = vmatpush2.bf16.msra.mxu0 %v1116_v14 }
  0x68   : > { %719 = vmatprep.subr.bf16.mxu0 %v1118_v15 }
  0x6b   : > { %720 = vmatpush2.bf16.msra.mxu0 %v1121_v16 }
  0x6e   : > { %722 = vmatmul.mubr.bf16.vlgmr.msra.gmra.mxu0 %v1122_v17 }
  0x6f   : > { %731 = vmatprep.mubr.bf16.mxu0 %v1126_v18 }
  0x76   : > { %732 = vmatmul.mubr.bf16.gmra.mxu0 %v1128_v19 }
  0xae   : > { %v455_v23 = vpop.permute.xlu1 %454 }
  0xaf   : > { %v465_v31 = vpop.permute.xlu0 %464 }
  0xb2   : > { %v460_v28 = vpop.permute.xlu1 %459 }
  0xb4   : > { %v470_v44 = vpop.permute.xlu0 %469 }
  0xf8   : > { %v776_v20 = vpop.f32.mrf.mxu1 }
  0xfa   : > { %v778_v21 = vpop.f32.mrf.mxu1 }
  0xfc   : > { %v780_v22 = vpop.f32.mrf.mxu1 }
  0xfe   : > { %v782_v25 = vpop.f32.mrf.mxu1 }
 0x100   : > { %v786_v30 = vpop.f32.mrf.mxu1 }
 0x102   : > { %v788_v38 = vpop.f32.mrf.mxu1 }
 0x104   : > { %v790_v49 = vpop.f32.mrf.mxu1 }
 0x106   : > { %v792_v60 = vpop.f32.mrf.mxu1 }
 0x12e   : > { %v723_v24 = vpop.f32.mrf.mxu0 }
 0x12f   : > { %v724_v36 = vadd.f32 %v723_v24, %v455_v23 }
 0x130   : > { %v725_v26 = vpop.f32.mrf.mxu0 }
 0x131   : > { %v726_v27 = vadd.f32 %v725_v26, %v455_v23  ;;  %v1415_v48 = vadd.f32 %v776_v20, %v724_v36 }
 0x132   : > { %v727_v29 = vpop.f32.mrf.mxu0 }
 0x133   : > { %v1407_v32 = vadd.f32 %v778_v21, %v726_v27  ;;  %v728_v33 = vadd.f32 %v727_v29, %v460_v28  ;;  %v1026_v59 = vmul.f32 -1.442695, %v1415_v48 }
 0x134   : > { %v729_v34 = vpop.f32.mrf.mxu0 }
 0x135   : > { %v730_v35 = vadd.f32 %v729_v34, %v460_v28  ;;  %v1027_v37 = vmul.f32 -1.442695, %v1407_v32  ;;  %v1412_v42 = vadd.f32 %v780_v22, %v728_v33 }
 0x136   : > { %v733_v39 = vpop.f32.mrf.mxu0 }
 0x137   : > { %v1410_v40 = vadd.f32 %v782_v25, %v730_v35  ;;  %v734_v41 = vadd.f32 %v733_v39, %v465_v31  ;;  %1129 = vpow2.f32 %v1027_v37  ;;  %v1028_v54 = vmul.f32 -1.442695, %v1412_v42  ;;  %v851_v37 = vld [vmem:[%s1445_s3] sm:$0x3] }
 0x138   : > { %v735_v43 = vpop.f32.mrf.mxu0 }
 0x139   : > { %v1029_v45 = vmul.f32 -1.442695, %v1410_v40  ;;  %v787_v46 = vadd.f32 %v786_v30, %v734_v41  ;;  %v736_v47 = vadd.f32 %v735_v43, %v465_v31 }
 0x13a   : > { %v737_v50 = vpop.f32.mrf.mxu0 }
 0x13b   : > { %1131 = vpow2.f32 %v1029_v45  ;;  %v1030_v51 = vmul.f32 -1.442695, %v787_v46  ;;  %v789_v52 = vadd.f32 %v788_v38, %v736_v47  ;;  %v738_v53 = vadd.f32 %v737_v50, %v470_v44  ;;  %v860_v38 = vpop.permute.xlu0 %859 }
 0x13c   : > { %v739_v55 = vpop.f32.mrf.mxu0 }
 0x13d   : > { %v1031_v56 = vmul.f32 -1.442695, %v789_v52  ;;  %v791_v57 = vadd.f32 %v790_v49, %v738_v53  ;;  %v740_v58 = vadd.f32 %v739_v55, %v470_v44  ;;  %1133 = vpow2.f32 %v1030_v51 }
 0x13f   : > { %1135 = vpow2.f32 %v1031_v56  ;;  %v1032_v61 = vmul.f32 -1.442695, %v791_v57  ;;  %v793_v62 = vadd.f32 %v792_v60, %v740_v58 }
 0x140   : > { %1137 = vpow2.f32 %v1028_v54 }
 0x141   : > { %1139 = vpow2.f32 %v1032_v61  ;;  %v1033_v63 = vmul.f32 -1.442695, %v793_v62 }
 0x142   : > { %1141 = vpow2.f32 %v1026_v59 }
 0x143   : > { %1143 = vpow2.f32 %v1033_v63 }
 0x144   : > { %v1130_v0 = vpop.eup %1129 }
 0x145   : > { %v820_v2 = vadd.f32 1.0, %v1130_v0 }
 0x147   : > { %1145 = vrcp.f32 %v820_v2 }
 0x148   : > { %v1132_v1 = vpop.eup %1131 }
 0x149   : > { %v822_v4 = vadd.f32 1.0, %v1132_v1 }
 0x14a   : > { %v1134_v3 = vpop.eup %1133 }
 0x14b   : > { %v823_v9 = vadd.f32 1.0, %v1134_v3  ;;  %1147 = vrcp.f32 %v822_v4 }
 0x14c   : > { %v1136_v5 = vpop.eup %1135 }
 0x14d   : > { %v1138_v6 = vpop.eup %1137  ;;  %v824_v7 = vadd.f32 1.0, %v1136_v5 }
 0x14e   : > { %v1140_v8 = vpop.eup %1139  ;;  %v821_v13 = vadd.f32 1.0, %v1138_v6 }
 0x14f   : > { %v1142_v10 = vpop.eup %1141  ;;  %v825_v11 = vadd.f32 1.0, %v1140_v8  ;;  %1149 = vrcp.f32 %v824_v7 }
 0x150   : > { %v1144_v12 = vpop.eup %1143  ;;  %v819_v15 = vadd.f32 1.0, %v1142_v10 }
 0x151   : > { %1151 = vrcp.f32 %v825_v11  ;;  %v826_v14 = vadd.f32 1.0, %v1144_v12 }
 0x152   : > { %1153 = vrcp.f32 %v823_v9 }
 0x153   : > { %1155 = vrcp.f32 %v826_v14 }
 0x154   : > { %1157 = vrcp.f32 %v821_v13  ;;  %v1146_v16 = vpop.eup %1145 }
 0x155   : > { %1159 = vrcp.f32 %v819_v15  ;;  %v844_v29 = vmul.f32 %v1146_v16, %v1407_v32 }
 0x158   : > { %v1148_v17 = vpop.eup %1147 }
 0x159   : > { %v846_v24 = vmul.f32 %v1148_v17, %v1410_v40 }
 0x15b   : > { %v853_v34 = vpack.c.bf16 %v846_v24, %v844_v29 }
 0x15c   : > { %v1150_v18 = vpop.eup %1149 }
 0x15d   : > { %v848_v25 = vmul.f32 %v1150_v18, %v789_v52 }
 0x15e   : > { %v1152_v19 = vpop.eup %1151 }
 0x15f   : > { %v1154_v20 = vpop.eup %1153  ;;  %v849_v22 = vmul.f32 %v1152_v19, %v791_v57 }
 0x160   : > { %v1156_v21 = vpop.eup %1155  ;;  %v847_v27 = vmul.f32 %v1154_v20, %v787_v46 }
 0x161   : > { %v1158_v23 = vpop.eup %1157  ;;  %v850_v26 = vmul.f32 %v1156_v21, %v793_v62 }
 0x162   : > { %v1160_v28 = vpop.eup %1159  ;;  %v845_v31 = vmul.f32 %v1158_v23, %v1412_v42  ;;  %v854_v33 = vpack.c.bf16 %v849_v22, %v847_v27 }
 0x163   : > { %v855_v30 = vpack.c.bf16 %v850_v26, %v848_v25  ;;  %v843_v35 = vmul.f32 %v1160_v28, %v1415_v48 }
 0x165   : > { %877 = vmatprep.subr.bf16.mxu1 %v855_v30  ;;  %v852_v36 = vpack.c.bf16 %v845_v31, %v843_v35 }
 0x166   : > { %878 = vmatpush1.bf16.msra.mxu1 %v854_v33 }
 0x167   : > { %879 = vmatprep.subr.bf16.mxu1 %v853_v34 }
 0x16a   : > { %880 = vmatpush1.bf16.msra.mxu1 %v852_v36 }
 0x16d   : > { %1034 = vmatmul.mubr.msk.bf16.vlgmr.msra.gmra.mxu1 %vm682_vm0, %v851_v37 }
 0x22d   : > { %v899_v32 = vpop.f32.mrf.mxu1 }
 0x22e   : > { %v900_v40 = vadd.f32 %v899_v32, %v860_v38 }
 0x22f   : > { %v901_v39 = vpop.f32.mrf.mxu1 }
 0x230   : > { %v902_v41 = vadd.f32 %v901_v39, %v860_v38 }
 0x231   : > { %v903_v42 = vpop.f32.mrf.mxu1 }
 0x232   : > { %v908_v43 = vcombine.low %v900_v40, %v902_v41 }
 0x233   : > { %v904_v44 = vpop.f32.mrf.mxu1 }
 0x234   : > { %910 = vst [vmem:[%s401_s23] sm:$0xff] %v908_v43 }
 0x235 PF: > { %p12_p9 = scmp.ge.s32.totalorder %s1233_s22, 4   ;;  %s1448_s18 = smov %s1179_s19 }
 0x236   : > { %s1449_s19 = smov %s1242_s25  ;;  %s1450_s20 = smov %s1233_s22 }
 0x237   :  { %14 = sbr.rel (!%p12_p9) target bundleno = 2 (0x2), region = 113 }

</bundles_post_ra>
